<compile_context>
chip_gen: v5e
topology: v5e:2x2
jax: 0.10.0
libtpu: 0.0.40
codegen_flags: <defaults>
</compile_context>

<pallas_src>
import jax
import jax.numpy as jnp
from jax.experimental import pallas as pl
from jax.experimental.pallas import tpu as pltpu

INPUT_DIM = 53
INPUT_DIM_PAD = 64        # fc1 contraction dim padded for clean VMEM layout / MXU feed
HIDDEN1 = 128
HIDDEN2 = 64
OUTPUT_DIM = 25
OUTPUT_DIM_PAD = 128      # lane-dense output block; padded logits driven to -1e30

NEG_BIG = -1e30

# Batch-tile cap. x tile ~1 MB bf16 + out tile ~4 MB f32, double-buffered ~10 MB:
# well under the scoped-VMEM limit we request below on every generation (incl. v7x).
MAX_BLOCK_BATCH = 8192


def _round_up(n, m):
    return ((n + m - 1) // m) * m


def dnn_kernel(x_ref, w1_ref, b1_ref, w2_ref, b2_ref, w3_ref, b3_ref, o_ref):
    x = x_ref[...]                                                    # (TB, 64) bf16

    # fc1 + ReLU  (Dropout is identity in inference mode)
    h1 = jnp.dot(x, w1_ref[...], preferred_element_type=jnp.float32) + b1_ref[...]
    h1 = jnp.maximum(h1, 0.0).astype(jnp.bfloat16)                    # (TB, 128)

    # fc2 + ReLU
    h2 = jnp.dot(h1, w2_ref[...], preferred_element_type=jnp.float32) + b2_ref[...]
    h2 = jnp.maximum(h2, 0.0).astype(jnp.bfloat16)                    # (TB, 64)

    # fc3: N padded to 128 lanes; padded columns carry bias -1e30 so exp() -> 0
    logits = jnp.dot(h2, w3_ref[...], preferred_element_type=jnp.float32) + b3_ref[...]  # (TB, 128)

    # Softmax over the last axis, exact f32 divide so rows sum to 1.
    m = jnp.max(logits, axis=-1, keepdims=True)
    e = jnp.exp(logits - m)
    denom = jnp.sum(e, axis=-1, keepdims=True)
    o_ref[...] = (e / denom).astype(o_ref.dtype)                      # lane-dense (TB, 128) store


def prepare_params(params):
    """One-time padding + bf16 cast of the weights (hoisted out of the call path)."""
    w1, b1, w2, b2, w3, b3 = params
    w1p = (jnp.zeros((INPUT_DIM_PAD, HIDDEN1), jnp.float32)
           .at[:INPUT_DIM, :].set(w1)).astype(jnp.bfloat16)
    w3p = (jnp.zeros((HIDDEN2, OUTPUT_DIM_PAD), jnp.float32)
           .at[:, :OUTPUT_DIM].set(w3)).astype(jnp.bfloat16)
    b3p = (jnp.full((1, OUTPUT_DIM_PAD), NEG_BIG, jnp.float32)
           .at[:, :OUTPUT_DIM].set(b3))
    return (w1p, b1.astype(jnp.float32), w2.astype(jnp.bfloat16),
            b2.astype(jnp.float32), w3p, b3p)


def dnn_forward(x, prepared_params, *, block_batch=MAX_BLOCK_BATCH):
    w1p, b1, w2b, b2, w3p, b3p = prepared_params
    batch = x.shape[0]

    # bf16 activations on the wire; pad the contraction dim 53 -> 64 with zeros.
    xb = x.astype(jnp.bfloat16)
    xb = jnp.pad(xb, ((0, 0), (0, INPUT_DIM_PAD - INPUT_DIM)))

    # Batch tile: multiple of 16 (bf16 sublane packing), capped at block_batch, and
    # >= 2 grid steps whenever the batch allows it (lets v7x shard the "parallel"
    # axis across both TensorCores; no effect on single-TC v5e/v6e).
    rb = _round_up(batch, 16)
    if rb >= 32:
        tb = min(block_batch, _round_up((rb + 1) // 2, 16))
    else:
        tb = rb
    padded = _round_up(batch, tb)
    if padded != batch:
        xb = jnp.pad(xb, ((0, padded - batch), (0, 0)))

    grid = (padded // tb,)

    flops = 2 * padded * (INPUT_DIM_PAD * HIDDEN1 + HIDDEN1 * HIDDEN2 + HIDDEN2 * OUTPUT_DIM_PAD)
    bytes_accessed = (xb.size * 2                        # x, bf16
                      + padded * OUTPUT_DIM_PAD * 4      # out, f32
                      + (w1p.size + w2b.size + w3p.size) * 2
                      + (b1.size + b2.size + b3p.size) * 4)
    cost = pl.CostEstimate(flops=flops,
                           transcendentals=padded * OUTPUT_DIM_PAD,
                           bytes_accessed=bytes_accessed)

    out = pl.pallas_call(
        dnn_kernel,
        out_shape=jax.ShapeDtypeStruct((padded, OUTPUT_DIM_PAD), jnp.float32),
        grid=grid,
        in_specs=[
            pl.BlockSpec((tb, INPUT_DIM_PAD), lambda i: (i, 0)),        # x: tiled over batch
            pl.BlockSpec((INPUT_DIM_PAD, HIDDEN1), lambda i: (0, 0)),   # weights/biases VMEM-resident
            pl.BlockSpec((1, HIDDEN1), lambda i: (0, 0)),
            pl.BlockSpec((HIDDEN1, HIDDEN2), lambda i: (0, 0)),
            pl.BlockSpec((1, HIDDEN2), lambda i: (0, 0)),
            pl.BlockSpec((HIDDEN2, OUTPUT_DIM_PAD), lambda i: (0, 0)),
            pl.BlockSpec((1, OUTPUT_DIM_PAD), lambda i: (0, 0)),
        ],
        out_specs=pl.BlockSpec((tb, OUTPUT_DIM_PAD), lambda i: (i, 0)),
        compiler_params=pltpu.CompilerParams(
            dimension_semantics=("parallel",),            # megacore sharding on v7x
            vmem_limit_bytes=32 * 1024 * 1024,            # explicit headroom (safe on v5e/v6e/v7x)
        ),
        cost_estimate=cost,
    )(xb, w1p, b1, w2b, b2, w3p, b3p)

    # Drop batch padding and the lane padding of the output.
    return out[:batch, :OUTPUT_DIM]


def init_params(key):
    # Deterministic init mimicking PyTorch Linear's uniform(-1/sqrt(fan_in), 1/sqrt(fan_in)).
    def linear(key, fan_in, fan_out):
        kw, kb = jax.random.split(key)
        bound = 1.0 / jnp.sqrt(float(fan_in))
        w = jax.random.uniform(kw, (fan_in, fan_out), jnp.float32, -bound, bound)
        b = jax.random.uniform(kb, (1, fan_out), jnp.float32, -bound, bound)
        return w, b

    k1, k2, k3 = jax.random.split(key, 3)
    w1, b1 = linear(k1, INPUT_DIM, HIDDEN1)
    w2, b2 = linear(k2, HIDDEN1, HIDDEN2)
    w3, b3 = linear(k3, HIDDEN2, OUTPUT_DIM)
    return w1, b1, w2, b2, w3, b3


def reference_forward(x, params):
    # Mirrors the kernel's arithmetic: bf16 operands, f32 accumulation, exact softmax.
    w1, b1, w2, b2, w3, b3 = params
    xb = x.astype(jnp.bfloat16)
    h1 = jnp.dot(xb, w1.astype(jnp.bfloat16), preferred_element_type=jnp.float32) + b1
    h1 = jnp.maximum(h1, 0.0).astype(jnp.bfloat16)
    h2 = jnp.dot(h1, w2.astype(jnp.bfloat16), preferred_element_type=jnp.float32) + b2
    h2 = jnp.maximum(h2, 0.0).astype(jnp.bfloat16)
    logits = jnp.dot(h2, w3.astype(jnp.bfloat16), preferred_element_type=jnp.float32) + b3
    return jax.nn.softmax(logits, axis=-1)


if __name__ == "__main__":
    key = jax.random.PRNGKey(0)
    kx, kp = jax.random.split(key)

    batch = 8
    x = jax.random.normal(kx, (batch, INPUT_DIM), jnp.float32)
    params = init_params(kp)
    prepared = prepare_params(params)

    forward = jax.jit(dnn_forward)
    out = forward(x, prepared)
    jax.block_until_ready(out)

    ref = reference_forward(x, params)
    assert out.shape == (batch, OUTPUT_DIM)
    # bf16 matmuls in both paths; f32 softmax in both -> tight agreement.
    assert jnp.allclose(out, ref, atol=2e-3, rtol=2e-3), "mismatch vs JAX reference"
    # Exact divide in the epilogue -> softmax rows sum to 1 within f32 precision.
    assert jnp.allclose(jnp.sum(out, axis=-1), 1.0, atol=1e-4)

    print("KERNEL_OK")
</pallas_src>

<mosaic_0001>
module attributes {stable_mosaic.version = 11 : i64} {
  func.func @dnn_kernel(%arg0: i32, %arg1: memref<16x64xbf16, #tpu.memory_space<vmem>>, %arg2: memref<64x128xbf16, #tpu.memory_space<vmem>>, %arg3: memref<1x128xf32, #tpu.memory_space<vmem>>, %arg4: memref<128x64xbf16, #tpu.memory_space<vmem>>, %arg5: memref<1x64xf32, #tpu.memory_space<vmem>>, %arg6: memref<64x128xbf16, #tpu.memory_space<vmem>>, %arg7: memref<1x128xf32, #tpu.memory_space<vmem>>, %arg8: memref<16x128xf32, #tpu.memory_space<vmem>>) attributes {dimension_semantics = [#tpu.dimension_semantics<parallel>], iteration_bounds = array<i64: 1>, scalar_prefetch = 0 : i64, scratch_operands = 0 : i64, tpu.core_type = #tpu.core_type<tc>, window_params = [{transform_indices = @transform_0, window_bounds = array<i64: 16, 64>}, {pipeline_mode = #tpu.pipeline_mode<synchronous>, transform_indices = @transform_1, window_bounds = array<i64: 64, 128>}, {pipeline_mode = #tpu.pipeline_mode<synchronous>, transform_indices = @transform_2, window_bounds = array<i64: 1, 128>}, {pipeline_mode = #tpu.pipeline_mode<synchronous>, transform_indices = @transform_3, window_bounds = array<i64: 128, 64>}, {pipeline_mode = #tpu.pipeline_mode<synchronous>, transform_indices = @transform_4, window_bounds = array<i64: 1, 64>}, {pipeline_mode = #tpu.pipeline_mode<synchronous>, transform_indices = @transform_5, window_bounds = array<i64: 64, 128>}, {pipeline_mode = #tpu.pipeline_mode<synchronous>, transform_indices = @transform_6, window_bounds = array<i64: 1, 128>}, {transform_indices = @transform_7, window_bounds = array<i64: 16, 128>}]} {
    %c0 = arith.constant 0 : index
    %c0_0 = arith.constant 0 : index
    %0 = vector.load %arg1[%c0, %c0_0] : memref<16x64xbf16, #tpu.memory_space<vmem>>, vector<16x64xbf16>
    %c0_1 = arith.constant 0 : index
    %c0_2 = arith.constant 0 : index
    %1 = vector.load %arg2[%c0_1, %c0_2] : memref<64x128xbf16, #tpu.memory_space<vmem>>, vector<64x128xbf16>
    %cst = arith.constant dense<0.000000e+00> : vector<16x128xf32>
    %2 = tpu.matmul %0, %1, %cst {dimension_numbers = #tpu.dot_dimension_numbers<[1], [0], [0], [1], [0, 0, 1, 1], [], []>} : vector<16x64xbf16>, vector<64x128xbf16>, vector<16x128xf32> -> vector<16x128xf32>
    %c0_3 = arith.constant 0 : index
    %c0_4 = arith.constant 0 : index
    %3 = vector.load %arg3[%c0_3, %c0_4] : memref<1x128xf32, #tpu.memory_space<vmem>>, vector<1x128xf32>
    %4 = vector.broadcast %3 : vector<1x128xf32> to vector<16x128xf32>
    %5 = arith.addf %2, %4 : vector<16x128xf32>
    %cst_5 = arith.constant 0.000000e+00 : f32
    %6 = vector.broadcast %cst_5 : f32 to vector<16x128xf32>
    %7 = arith.maximumf %5, %6 : vector<16x128xf32>
    %8 = arith.truncf %7 : vector<16x128xf32> to vector<16x128xbf16>
    %c0_6 = arith.constant 0 : index
    %c0_7 = arith.constant 0 : index
    %9 = vector.load %arg4[%c0_6, %c0_7] : memref<128x64xbf16, #tpu.memory_space<vmem>>, vector<128x64xbf16>
    %cst_8 = arith.constant dense<0.000000e+00> : vector<16x64xf32>
    %10 = tpu.matmul %8, %9, %cst_8 {dimension_numbers = #tpu.dot_dimension_numbers<[1], [0], [0], [1], [0, 0, 1, 1], [], []>} : vector<16x128xbf16>, vector<128x64xbf16>, vector<16x64xf32> -> vector<16x64xf32>
    %c0_9 = arith.constant 0 : index
    %c0_10 = arith.constant 0 : index
    %11 = vector.load %arg5[%c0_9, %c0_10] : memref<1x64xf32, #tpu.memory_space<vmem>>, vector<1x64xf32>
    %12 = vector.broadcast %11 : vector<1x64xf32> to vector<16x64xf32>
    %13 = arith.addf %10, %12 : vector<16x64xf32>
    %cst_11 = arith.constant 0.000000e+00 : f32
    %14 = vector.broadcast %cst_11 : f32 to vector<16x64xf32>
    %15 = arith.maximumf %13, %14 : vector<16x64xf32>
    %16 = arith.truncf %15 : vector<16x64xf32> to vector<16x64xbf16>
    %c0_12 = arith.constant 0 : index
    %c0_13 = arith.constant 0 : index
    %17 = vector.load %arg6[%c0_12, %c0_13] : memref<64x128xbf16, #tpu.memory_space<vmem>>, vector<64x128xbf16>
    %cst_14 = arith.constant dense<0.000000e+00> : vector<16x128xf32>
    %18 = tpu.matmul %16, %17, %cst_14 {dimension_numbers = #tpu.dot_dimension_numbers<[1], [0], [0], [1], [0, 0, 1, 1], [], []>} : vector<16x64xbf16>, vector<64x128xbf16>, vector<16x128xf32> -> vector<16x128xf32>
    %c0_15 = arith.constant 0 : index
    %c0_16 = arith.constant 0 : index
    %19 = vector.load %arg7[%c0_15, %c0_16] : memref<1x128xf32, #tpu.memory_space<vmem>>, vector<1x128xf32>
    %20 = vector.broadcast %19 : vector<1x128xf32> to vector<16x128xf32>
    %21 = arith.addf %18, %20 : vector<16x128xf32>
    %cst_17 = arith.constant dense<0xFF800000> : vector<16xf32>
    %22 = vector.multi_reduction <maximumf>, %21, %cst_17 [1] : vector<16x128xf32> to vector<16xf32>
    %23 = vector.shape_cast %22 : vector<16xf32> to vector<16x1xf32>
    %24 = vector.broadcast %23 : vector<16x1xf32> to vector<16x128xf32>
    %25 = arith.subf %21, %24 : vector<16x128xf32>
    %26 = math.exp %25 : vector<16x128xf32>
    %cst_18 = arith.constant dense<0.000000e+00> : vector<16xf32>
    %27 = vector.multi_reduction <add>, %26, %cst_18 [1] : vector<16x128xf32> to vector<16xf32>
    %28 = vector.shape_cast %27 : vector<16xf32> to vector<16x1xf32>
    %29 = vector.broadcast %28 : vector<16x1xf32> to vector<16x128xf32>
    %30 = arith.divf %26, %29 : vector<16x128xf32>
    %c0_19 = arith.constant 0 : index
    %c0_20 = arith.constant 0 : index
    %31 = vector.load %arg8[%c0_19, %c0_20] : memref<16x128xf32, #tpu.memory_space<vmem>>, vector<16x128xf32>
    tpu.vector_store %arg8[%c0_19, %c0_20], %30 {strides = array<i32>} : memref<16x128xf32, #tpu.memory_space<vmem>>, vector<16x128xf32>,
    return
  }
  func.func @transform_0(%arg0: i32) -> (i32, i32) {
    %c0_i32 = arith.constant 0 : i32
    %c0_i32_0 = arith.constant 0 : i32
    return %arg0, %c0_i32 : i32, i32
  }
  func.func @transform_1(%arg0: i32) -> (i32, i32) {
    %c0_i32 = arith.constant 0 : i32
    %c0_i32_0 = arith.constant 0 : i32
    %c0_i32_1 = arith.constant 0 : i32
    return %c0_i32, %c0_i32_0 : i32, i32
  }
  func.func @transform_2(%arg0: i32) -> (i32, i32) {
    %c0_i32 = arith.constant 0 : i32
    %c0_i32_0 = arith.constant 0 : i32
    %c0_i32_1 = arith.constant 0 : i32
    return %c0_i32, %c0_i32_0 : i32, i32
  }
  func.func @transform_3(%arg0: i32) -> (i32, i32) {
    %c0_i32 = arith.constant 0 : i32
    %c0_i32_0 = arith.constant 0 : i32
    %c0_i32_1 = arith.constant 0 : i32
    return %c0_i32, %c0_i32_0 : i32, i32
  }
  func.func @transform_4(%arg0: i32) -> (i32, i32) {
    %c0_i32 = arith.constant 0 : i32
    %c0_i32_0 = arith.constant 0 : i32
    %c0_i32_1 = arith.constant 0 : i32
    return %c0_i32, %c0_i32_0 : i32, i32
  }
  func.func @transform_5(%arg0: i32) -> (i32, i32) {
    %c0_i32 = arith.constant 0 : i32
    %c0_i32_0 = arith.constant 0 : i32
    %c0_i32_1 = arith.constant 0 : i32
    return %c0_i32, %c0_i32_0 : i32, i32
  }
  func.func @transform_6(%arg0: i32) -> (i32, i32) {
    %c0_i32 = arith.constant 0 : i32
    %c0_i32_0 = arith.constant 0 : i32
    %c0_i32_1 = arith.constant 0 : i32
    return %c0_i32, %c0_i32_0 : i32, i32
  }
  func.func @transform_7(%arg0: i32) -> (i32, i32) {
    %c0_i32 = arith.constant 0 : i32
    %c0_i32_0 = arith.constant 0 : i32
    return %arg0, %c0_i32 : i32, i32
  }
}

</mosaic_0001>

<bundles_post_ra>
// kernel: dnn_forward.1
= control target key start
LH: loop header
LB: loop body
LE: loop exit
PB: predicated region body
PF: predicated region fallthrough
CT: control target
= control target key end

     0   :  { %vm70_vm0 = vcmask 523264   ;;  %s485_s1 = inlined_call_operand.vmem [shape: bf16[64,128], index: 1, kind: input, shape index: {}]   ;;  %s486_s3 = inlined_call_operand.vmem [shape: bf16[128,64], index: 3, kind: input, shape index: {}]   ;;  %s487_s2 = inlined_call_operand.vmem [shape: f32[1,128], index: 2, kind: input, shape index: {}]   ;;  %s488_s0 = inlined_call_operand.vmem [shape: bf16[16,64], index: 0, kind: input, shape index: {}]   ;;  %s489_s4 = inlined_call_operand.vmem [shape: f32[1,64], index: 4, kind: input, shape index: {}]   ;;  %s490_s6 = inlined_call_operand.vmem [shape: f32[1,128], index: 6, kind: input, shape index: {}]   ;;  %s491_s5 = inlined_call_operand.vmem [shape: bf16[64,128], index: 5, kind: input, shape index: {}]   ;;  %s492_s7 = inlined_call_operand.vmem [shape: f32[16,128], index: 7, kind: output, shape index: {}]  }
   0x1   :  { %v353_v0 = vld [vmem:[%s485_s1 + $0x18] sm:$0xff]  ;;  %v352_v2 = vld [vmem:[%s485_s1 + $0x10] sm:$0xff]  ;;  %v351_v4 = vld [vmem:[%s485_s1 + $0x8] sm:$0xff] }
   0x2   :  { %v361_v1 = vld [vmem:[%s486_s3 + $0x38] sm:$0xff]  ;;  %78 = vmatpush.bf16.msra.mxu0 %v353_v0  ;;  %v360_v3 = vld [vmem:[%s486_s3 + $0x30] sm:$0xff]  ;;  %v359_v5 = vld [vmem:[%s486_s3 + $0x28] sm:$0xff] }
   0x3   :  { %159 = vmatpush.bf16.msra.mxu1 %v361_v1  ;;  %v350_v6 = vld [vmem:[%s485_s1] sm:$0xff]  ;;  %v357_v9 = vld [vmem:[%s486_s3 + $0x18] sm:$0xff]  ;;  %v356_v10 = vld [vmem:[%s486_s3 + $0x10] sm:$0xff] }
   0x4   :  { %v358_v7 = vld [vmem:[%s486_s3 + $0x20] sm:$0xff]  ;;  %v355_v11 = vld [vmem:[%s486_s3 + $0x8] sm:$0xff]  ;;  %v365_v21 = vld [vmem:[%s491_s5 + $0x18] sm:$0xff] }
   0x5   :  { %v349_v8 = vld [vmem:[%s488_s0] sm:$0xff]  ;;  %219 = vmatpush.bf16.msra.mxu2 %v365_v21  ;;  %v364_v22 = vld [vmem:[%s491_s5 + $0x10] sm:$0xff]  ;;  %v363_v23 = vld [vmem:[%s491_s5 + $0x8] sm:$0xff] }
   0x6   :  { %79 = vmatpush.bf16.msra.mxu0 %v352_v2  ;;  %v354_v12 = vld [vmem:[%s486_s3] sm:$0xff] }
   0x7   :  { %160 = vmatpush.bf16.msra.mxu1 %v360_v3  ;;  %v366_v14 = vld [vmem:[%s487_s2] ss:$0 sm:$0xff] }
   0x8   :  { %v362_v24 = vld [vmem:[%s491_s5] sm:$0xff] }
   0x9   :  { %220 = vmatpush.bf16.msra.mxu2 %v364_v22  ;;  %v367_v26 = vld [vmem:[%s489_s4] ss:$0 sm:$0xff] }
   0xa   :  { %80 = vmatpush.bf16.msra.mxu0 %v351_v4  ;;  %v368_v33 = vld [vmem:[%s490_s6] ss:$0 sm:$0xff] }
   0xb   :  { %161 = vmatpush.bf16.msra.mxu1 %v359_v5 }
   0xd   :  { %221 = vmatpush.bf16.msra.mxu2 %v363_v23 }
   0xe   :  { %81 = vmatpush.bf16.msra.mxu0 %v350_v6 }
   0xf   :  { %162 = vmatpush.bf16.msra.mxu1 %v358_v7 }
  0x11   :  { %299 = vmatmul.msk.bf16.vlgmr.msra.gmra.mxu0 %vm70_vm0, %v349_v8  ;;  %222 = vmatpush.bf16.msra.mxu2 %v362_v24 }
  0x13   :  { %163 = vmatpush.bf16.msra.mxu1 %v357_v9 }
  0x17   :  { %164 = vmatpush.bf16.msra.mxu1 %v356_v10 }
  0x1b   :  { %165 = vmatpush.bf16.msra.mxu1 %v355_v11 }
  0x1f   :  { %166 = vmatpush.bf16.msra.mxu1 %v354_v12 }
  0x8e   :  { %v83_v13 = vpop.f32.mrf.mxu0 }
  0x8f   :  { %v84_v15 = vadd.f32 %v366_v14, %v83_v13 }
  0x91   :  { %v88_v18 = vmax.f32 %v84_v15, 0.0 }
  0x96   :  { %v85_v16 = vpop.f32.mrf.mxu0 }
  0x97   :  { %v86_v17 = vadd.f32 %v366_v14, %v85_v16 }
  0x99   :  { %v89_v19 = vmax.f32 %v86_v17, 0.0 }
  0x9b   :  { %v90_v20 = vpack.c.bf16 %v89_v19, %v88_v18 }
  0x9d   :  { %167 = vmatmul.bf16.vlgmr.msra.gmra.mxu1 %v90_v20 }
 0x11a   :  { %v168_v25 = vpop.f32.mrf.mxu1 }
 0x11b   :  { %v169_v27 = vadd.f32 %v367_v26, %v168_v25 }
 0x11d   :  { %v173_v30 = vmax.f32 %v169_v27, 0.0 }
 0x122   :  { %v170_v28 = vpop.f32.mrf.mxu1 }
 0x123   :  { %v171_v29 = vadd.f32 %v367_v26, %v170_v28 }
 0x125   :  { %v174_v31 = vmax.f32 %v171_v29, 0.0 }
 0x127   :  { %v175_v32 = vpack.c.bf16 %v174_v31, %v173_v30 }
 0x129   :  { %348 = vmatmul.msk.bf16.vlgmr.msra.gmra.mxu2 %vm70_vm0, %v175_v32 }
 0x1ac   :  { %v224_v34 = vpop.f32.mrf.mxu2 }
 0x1ad   :  { %v225_v35 = vadd.f32 %v368_v33, %v224_v34 }
 0x1af   :  { %229 = vmax.xlane.f32.xlu0 %v225_v35 }
 0x1b4   :  { %v226_v36 = vpop.f32.mrf.mxu2 }
 0x1b5   :  { %v227_v37 = vadd.f32 %v368_v33, %v226_v36 }
 0x1b7   :  { %231 = vmax.xlane.f32.xlu0 %v227_v37 }
 0x222   :  { %v230_v38 = vpop.xlane.xlu0 %229 }
 0x223   :  { %v233_v39 = vsub.f32 %v225_v35, %v230_v38 }
 0x225   :  { %v235_v40 = vmul.f32 1.442695, %v233_v39 }
 0x227   :  { %369 = vpow2.f32 %v235_v40 }
 0x22a   :  { %v232_v41 = vpop.xlane.xlu0 %231 }
 0x22b   :  { %v234_v42 = vsub.f32 %v227_v37, %v232_v41 }
 0x22d   :  { %v370_v43 = vpop.eup %369  ;;  %v237_v44 = vmul.f32 1.442695, %v234_v42 }
 0x22e   :  { %239 = vadd.xlane.f32.xlu1 %v370_v43 }
 0x22f   :  { %371 = vpow2.f32 %v237_v44 }
 0x235   :  { %v372_v45 = vpop.eup %371 }
 0x236   :  { %241 = vadd.xlane.f32.xlu1 %v372_v45 }
 0x2a1   :  { %v240_v46 = vpop.xlane.xlu1 %239 }
 0x2a2   :  { %373 = vrcp.f32 %v240_v46  ;;  %v254_v51 = vand.u32 2147483648, %v240_v46  ;;  %v252_v53 = vand.u32 2147483647, %v240_v46  ;;  %vm248_vm2 = vweird.f32 %v240_v46 }
 0x2a4   :  { %v255_v56 = vor.u32 1.1754944e-38, %v254_v51  ;;  %vm253_vm4 = vcmp.eq.f32.partialorder %v252_v53, 8.507059e+37 }
 0x2a8   :  { %v374_v47 = vpop.eup %373 }
 0x2a9   :  { %v244_v48 = vmul.f32 %v374_v47, %v240_v46  ;;  %v242_v49 = vpop.xlane.xlu1 %241  ;;  %vm249_vm1 = vweird.f32 %v374_v47 }
 0x2aa   :  { %375 = vrcp.f32 %v242_v49  ;;  %vm250_vm3 = vmor %vm248_vm2, %vm249_vm1  ;;  %v269_v62 = vand.u32 2147483648, %v242_v49  ;;  %v267_v0 = vand.u32 2147483647, %v242_v49  ;;  %vm263_vm6 = vweird.f32 %v242_v49 }
 0x2ab   :  { %v245_v50 = vsub.f32 1.0, %v244_v48 }
 0x2ac   :  { %v270_v2 = vor.u32 1.1754944e-38, %v269_v62  ;;  %vm268_vm8 = vcmp.eq.f32.partialorder %v267_v0, 8.507059e+37 }
 0x2ad   :  { %v246_v52 = vmul.f32 %v374_v47, %v245_v50 }
 0x2af   :  { %v247_v54 = vadd.f32 %v374_v47, %v246_v52 }
 0x2b0   :  { %v376_v55 = vpop.eup %375 }
 0x2b1   :  { %v251_v57 = vsel %vm250_vm3, %v374_v47, %v247_v54  ;;  %v259_v58 = vmul.f32 %v376_v55, %v242_v49  ;;  %vm264_vm5 = vweird.f32 %v376_v55 }
 0x2b2   :  { %v256_v59 = vsel %vm253_vm4, %v255_v56, %v251_v57  ;;  %vm265_vm7 = vmor %vm263_vm6, %vm264_vm5 }
 0x2b3   :  { %v257_v60 = vmul.f32 %v370_v43, %v256_v59  ;;  %v260_v61 = vsub.f32 1.0, %v259_v58 }
 0x2b5   :  { %273 = vst [vmem:[%s492_s7] sm:$0xff] %v257_v60  ;;  %v261_v63 = vmul.f32 %v376_v55, %v260_v61 }
 0x2b7   :  { %v262_v1 = vadd.f32 %v376_v55, %v261_v63 }
 0x2b9   :  { %v266_v3 = vsel %vm265_vm7, %v376_v55, %v262_v1 }
 0x2ba   :  { %v271_v4 = vsel %vm268_vm8, %v270_v2, %v266_v3 }
 0x2bb   :  { %v272_v5 = vmul.f32 %v372_v45, %v271_v4 }
 0x2bd   :  { %274 = vst [vmem:[%s492_s7 + $0x8] sm:$0xff] %v272_v5 }

</bundles_post_ra>
